<compile_context>
chip_gen: v7x
topology: tpu7x:2x2x1
jax: 0.10.0
libtpu: 0.0.40
codegen_flags: <defaults>
</compile_context>

<pallas_src>
import functools

import jax
import jax.numpy as jnp
from jax.experimental import pallas as pl
from jax.experimental.pallas import tpu as pltpu


def _round_up(x, m):
    return (x + m - 1) // m * m


def _pad2(x, rows, cols):
    r, c = x.shape
    return jnp.pad(x, ((0, rows - r), (0, cols - c)))


# ---------------------------------------------------------------------------
# Fused GCN layer kernel.
#   grid = (row tiles of A, k tiles over A columns)
#   inputs : X_scaled (resident), W (resident), A_bin int8 tile, dinv row tile,
#            bias (resident)
#   scratch: M = X_scaled @ W  (full, VMEM resident, recomputed per row tile at
#            k == 0 so the kernel stays correct when the "parallel" row axis is
#            sharded across TensorCores), f32 accumulator (only if num_k > 1).
# ---------------------------------------------------------------------------
def gcn_layer_kernel(x_ref, w_ref, a_ref, dinv_ref, b_ref, o_ref, m_ref,
                     *acc_refs, apply_relu, tk, num_k):
    k = pl.program_id(1)

    # Feature transform once per row tile (redundant MXU work is negligible and
    # fully hidden on a memory-bound kernel; keeps megacore sharding correct).
    @pl.when(k == 0)
    def _():
        m_ref[...] = jnp.dot(
            x_ref[...], w_ref[...], preferred_element_type=jnp.float32
        ).astype(m_ref.dtype)

    # Binary adjacency tile (0/1) -> bf16 for the MXU (exact; f32 hop keeps the
    # cast on guaranteed-supported conversions).
    a_bf16 = a_ref[...].astype(jnp.float32).astype(jnp.bfloat16)

    if num_k == 1:
        m_blk = m_ref[...]
    else:
        start = pl.multiple_of(k * tk, tk)
        m_blk = m_ref[pl.ds(start, tk), :]

    part = jnp.dot(a_bf16, m_blk, preferred_element_type=jnp.float32)

    if num_k == 1:
        # Single contraction step: no accumulator scratch, no pl.when phases.
        out = part * dinv_ref[...] + b_ref[...]
        if apply_relu:
            out = jnp.maximum(out, 0.0)
        o_ref[...] = out.astype(o_ref.dtype)
    else:
        (acc_ref,) = acc_refs

        @pl.when(k == 0)
        def _():
            acc_ref[...] = part

        @pl.when(k > 0)
        def _():
            acc_ref[...] += part

        @pl.when(k == num_k - 1)
        def _():
            out = acc_ref[...] * dinv_ref[...] + b_ref[...]
            if apply_relu:
                out = jnp.maximum(out, 0.0)
            o_ref[...] = out.astype(o_ref.dtype)


def gcn_layer(a, x, w, b, dinv, *, apply_relu, out_dtype, tm, tk):
    """OUT = dinv_rows * (A_bin @ (X_scaled @ W)) + b   [optional ReLU]."""
    n_pad = a.shape[0]
    f_pad = x.shape[1]
    h_pad = w.shape[1]
    num_k = n_pad // tk
    grid = (n_pad // tm, num_k)

    kernel = functools.partial(
        gcn_layer_kernel, apply_relu=apply_relu, tk=tk, num_k=num_k
    )

    scratch = [pltpu.VMEM((n_pad, h_pad), jnp.bfloat16)]       # M (resident)
    if num_k > 1:
        scratch.append(pltpu.VMEM((tm, h_pad), jnp.float32))   # accumulator

    cost = pl.CostEstimate(
        flops=int(2 * n_pad * n_pad * h_pad
                  + 2 * grid[0] * n_pad * f_pad * h_pad),
        transcendentals=0,
        bytes_accessed=int(
            a.size * a.dtype.itemsize
            + x.size * x.dtype.itemsize
            + w.size * w.dtype.itemsize
            + b.size * b.dtype.itemsize
            + dinv.size * dinv.dtype.itemsize
            + n_pad * h_pad * jnp.dtype(out_dtype).itemsize
        ),
    )

    return pl.pallas_call(
        kernel,
        out_shape=jax.ShapeDtypeStruct((n_pad, h_pad), out_dtype),
        grid=grid,
        in_specs=[
            pl.BlockSpec((n_pad, f_pad), lambda i, k: (0, 0)),   # X (resident)
            pl.BlockSpec((f_pad, h_pad), lambda i, k: (0, 0)),   # W (resident)
            pl.BlockSpec((tm, tk), lambda i, k: (i, k)),          # A_bin tile
            pl.BlockSpec((tm, 1), lambda i, k: (i, 0)),           # dinv rows
            pl.BlockSpec((1, h_pad), lambda i, k: (0, 0)),        # bias
        ],
        out_specs=pl.BlockSpec((tm, h_pad), lambda i, k: (i, 0)),
        scratch_shapes=scratch,
        compiler_params=pltpu.CompilerParams(
            dimension_semantics=("parallel", "arbitrary"),
            vmem_limit_bytes=32 * 1024 * 1024,
        ),
        cost_estimate=cost,
    )(x, w, a, dinv, b)


# ---------------------------------------------------------------------------
# Graph operands: binary (A + I) built directly at padded size in int8, plus
# the padded D^{-1/2} vector (zero on padded rows).
# ---------------------------------------------------------------------------
def build_graph(edge_index, num_nodes, n_pad):
    src = edge_index[0].astype(jnp.int32)
    dst = edge_index[1].astype(jnp.int32)
    a = jnp.zeros((n_pad, n_pad), jnp.int8)
    # set (not add): duplicate edges / pre-existing self loops collapse to 1,
    # matching gcn_norm's "add missing self loops" semantics.
    a = a.at[dst, src].set(jnp.int8(1))
    diag = jnp.arange(num_nodes, dtype=jnp.int32)
    a = a.at[diag, diag].set(jnp.int8(1))
    deg = jnp.sum(a.astype(jnp.int32), axis=1).astype(jnp.float32)
    dinv = jnp.where(deg > 0, jax.lax.rsqrt(deg), 0.0)
    return a, dinv.reshape(n_pad, 1)


# ---------------------------------------------------------------------------
# Two-layer GCN forward:
#   H   = relu(A_hat @ (X @ W1) + b1)
#   OUT =      A_hat @ (H @ W2) + b2
# with A_hat = D^{-1/2} (A + I) D^{-1/2} folded into per-row/col scalings.
# ---------------------------------------------------------------------------
def gcn_forward(x, edge_index, w1, b1, w2, b2):
    n, f = x.shape
    hdim = w1.shape[1]
    odim = w2.shape[1]

    # ---- tiling plan --------------------------------------------------------
    if n <= 2048:
        n_pad = _round_up(n, 128)
        tm = n_pad // 2          # >= 2 row tiles -> both v7x TensorCores busy
        tk = n_pad               # single k step -> no accumulator needed
    else:
        tm, tk = 512, 2048       # ~1 MiB int8 A tile, 8x fewer steps than 256x512
        n_pad = _round_up(n, 2048)

    f_pad = _round_up(f, 128)
    h_pad = _round_up(hdim, 128)
    o_pad = _round_up(odim, 128)

    # ---- graph operands (1-byte adjacency, folded normalization) ------------
    a_pad, dinv = build_graph(edge_index, n, n_pad)

    # ---- parameters (small; pad + cast in plain JAX) -------------------------
    w1_p = _pad2(w1, f_pad, h_pad).astype(jnp.bfloat16)
    w2_p = _pad2(w2, h_pad, o_pad).astype(jnp.bfloat16)
    b1_p = _pad2(b1, 1, h_pad).astype(jnp.float32)
    b2_p = _pad2(b2, 1, o_pad).astype(jnp.float32)

    # ---- layer 1 -------------------------------------------------------------
    x_pad = _pad2(x.astype(jnp.float32), n_pad, f_pad)
    x1 = (x_pad * dinv).astype(jnp.bfloat16)           # fold D^{-1/2} columns
    h = gcn_layer(a_pad, x1, w1_p, b1_p, dinv,
                  apply_relu=True, out_dtype=jnp.float32, tm=tm, tk=tk)

    # ---- layer 2 -------------------------------------------------------------
    x2 = (h * dinv).astype(jnp.bfloat16)                # dinv=0 zeroes padded rows
    out = gcn_layer(a_pad, x2, w2_p, b2_p, dinv,
                    apply_relu=False, out_dtype=jnp.float32, tm=tm, tk=tk)

    return out[:n, :odim]


# ---------------------------------------------------------------------------
# Pure-JAX references.
# ---------------------------------------------------------------------------
def gcn_reference_f32(a_hat, x, w1, b1, w2, b2):
    h = jnp.maximum(a_hat @ (x @ w1) + b1, 0.0)
    return a_hat @ (h @ w2) + b2


def gcn_reference_bf16(a_bin, dinv, x, w1, b1, w2, b2):
    """Same bf16-MXU / f32-accumulate / folded-scaling math as the kernel."""
    bf16, f32 = jnp.bfloat16, jnp.float32
    a = a_bin.astype(bf16)                               # 0/1 -> exact in bf16
    m1 = jnp.dot((x * dinv).astype(bf16), w1.astype(bf16),
                 preferred_element_type=f32).astype(bf16)
    h = jnp.maximum(jnp.dot(a, m1, preferred_element_type=f32) * dinv + b1, 0.0)
    m2 = jnp.dot((h * dinv).astype(bf16), w2.astype(bf16),
                 preferred_element_type=f32).astype(bf16)
    return jnp.dot(a, m2, preferred_element_type=f32) * dinv + b2


if __name__ == "__main__":
    # --- small deterministic problem ----------------------------------------
    num_nodes = 16
    num_node_features = 8
    hidden_channels = 32
    output_size = 4

    key = jax.random.PRNGKey(0)
    kx, kw1, kb1, kw2, kb2 = jax.random.split(key, 5)

    # node features (data.x)
    x = jax.random.normal(kx, (num_nodes, num_node_features), jnp.float32)

    # deterministic undirected ring graph (data.edge_index), shape [2, E]
    nodes = jnp.arange(num_nodes)
    nxt = (nodes + 1) % num_nodes
    edge_index = jnp.concatenate(
        [jnp.stack([nodes, nxt], axis=0), jnp.stack([nxt, nodes], axis=0)],
        axis=1,
    ).astype(jnp.int32)

    # GCNConv parameters (deterministic init; Glorot-like scaling)
    w1 = jax.random.normal(kw1, (num_node_features, hidden_channels),
                           jnp.float32) * (1.0 / jnp.sqrt(num_node_features))
    b1 = jax.random.normal(kb1, (1, hidden_channels), jnp.float32) * 0.01
    w2 = jax.random.normal(kw2, (hidden_channels, output_size),
                           jnp.float32) * (1.0 / jnp.sqrt(hidden_channels))
    b2 = jax.random.normal(kb2, (1, output_size), jnp.float32) * 0.01

    # --- run -----------------------------------------------------------------
    fwd = jax.jit(gcn_forward)
    out = fwd(x, edge_index, w1, b1, w2, b2)
    out = jax.block_until_ready(out)

    # --- references (unpadded) ------------------------------------------------
    a_bin, dinv = build_graph(edge_index, num_nodes, num_nodes)
    a_hat = dinv * a_bin.astype(jnp.float32) * dinv.T
    ref_bf16 = gcn_reference_bf16(a_bin, dinv, x, w1, b1, w2, b2)
    ref_f32 = gcn_reference_f32(a_hat, x, w1, b1, w2, b2)

    assert out.shape == (num_nodes, output_size)
    # tight check vs a reference using identical bf16-MXU / f32-acc math
    assert jnp.allclose(out, ref_bf16, atol=2e-2, rtol=2e-2)
    # sanity check vs the full-f32 reference (bf16 operand rounding tolerance)
    assert jnp.allclose(out, ref_f32, atol=5e-2, rtol=5e-2)

    print("KERNEL_OK")
</pallas_src>

<mosaic_0001>
module attributes {stable_mosaic.version = 11 : i64} {
  func.func @gcn_layer_kernel(%arg0: i32, %arg1: i32, %arg2: memref<128x128xbf16, #tpu.memory_space<vmem>>, %arg3: memref<128x128xbf16, #tpu.memory_space<vmem>>, %arg4: memref<64x128xi8, #tpu.memory_space<vmem>>, %arg5: memref<64x1xf32, #tpu.memory_space<vmem>>, %arg6: memref<1x128xf32, #tpu.memory_space<vmem>>, %arg7: memref<64x128xf32, #tpu.memory_space<vmem>>, %arg8: memref<128x128xbf16, #tpu.memory_space<vmem>>) attributes {dimension_semantics = [#tpu.dimension_semantics<parallel>, #tpu.dimension_semantics<arbitrary>], iteration_bounds = array<i64: 2, 1>, scalar_prefetch = 0 : i64, scratch_operands = 1 : i64, tpu.core_type = #tpu.core_type<tc>, window_params = [{pipeline_mode = #tpu.pipeline_mode<synchronous>, transform_indices = @transform_0, window_bounds = array<i64: 128, 128>}, {pipeline_mode = #tpu.pipeline_mode<synchronous>, transform_indices = @transform_1, window_bounds = array<i64: 128, 128>}, {transform_indices = @transform_2, window_bounds = array<i64: 64, 128>}, {transform_indices = @transform_3, window_bounds = array<i64: 64, 1>}, {pipeline_mode = #tpu.pipeline_mode<synchronous>, transform_indices = @transform_4, window_bounds = array<i64: 1, 128>}, {transform_indices = @transform_5, window_bounds = array<i64: 64, 128>}]} {
    %c0_i32 = arith.constant 0 : i32
    %0 = arith.cmpi eq, %arg1, %c0_i32 : i32
    %1 = arith.extui %0 : i1 to i32
    %c0_i32_0 = arith.constant 0 : i32
    %2 = arith.cmpi ne, %1, %c0_i32_0 : i32
    scf.if %2 {
      %c0_11 = arith.constant 0 : index
      %c0_12 = arith.constant 0 : index
      %17 = vector.load %arg2[%c0_11, %c0_12] : memref<128x128xbf16, #tpu.memory_space<vmem>>, vector<128x128xbf16>
      %c0_13 = arith.constant 0 : index
      %c0_14 = arith.constant 0 : index
      %18 = vector.load %arg3[%c0_13, %c0_14] : memref<128x128xbf16, #tpu.memory_space<vmem>>, vector<128x128xbf16>
      %cst_15 = arith.constant dense<0.000000e+00> : vector<128x128xf32>
      %19 = tpu.matmul %17, %18, %cst_15 {dimension_numbers = #tpu.dot_dimension_numbers<[1], [0], [0], [1], [0, 0, 1, 1], [], []>} : vector<128x128xbf16>, vector<128x128xbf16>, vector<128x128xf32> -> vector<128x128xf32>
      %20 = arith.truncf %19 : vector<128x128xf32> to vector<128x128xbf16>
      %c0_16 = arith.constant 0 : index
      %c0_17 = arith.constant 0 : index
      %21 = vector.load %arg8[%c0_16, %c0_17] : memref<128x128xbf16, #tpu.memory_space<vmem>>, vector<128x128xbf16>
      tpu.vector_store %arg8[%c0_16, %c0_17], %20 {strides = array<i32>} : memref<128x128xbf16, #tpu.memory_space<vmem>>, vector<128x128xbf16>,
    } else {
    }
    %c0 = arith.constant 0 : index
    %c0_1 = arith.constant 0 : index
    %3 = vector.load %arg4[%c0, %c0_1] : memref<64x128xi8, #tpu.memory_space<vmem>>, vector<64x128xi8>
    %4 = arith.sitofp %3 : vector<64x128xi8> to vector<64x128xf32>
    %5 = arith.truncf %4 : vector<64x128xf32> to vector<64x128xbf16>
    %c0_2 = arith.constant 0 : index
    %c0_3 = arith.constant 0 : index
    %6 = vector.load %arg8[%c0_2, %c0_3] : memref<128x128xbf16, #tpu.memory_space<vmem>>, vector<128x128xbf16>
    %cst = arith.constant dense<0.000000e+00> : vector<64x128xf32>
    %7 = tpu.matmul %5, %6, %cst {dimension_numbers = #tpu.dot_dimension_numbers<[1], [0], [0], [1], [0, 0, 1, 1], [], []>} : vector<64x128xbf16>, vector<128x128xbf16>, vector<64x128xf32> -> vector<64x128xf32>
    %c0_4 = arith.constant 0 : index
    %c0_5 = arith.constant 0 : index
    %8 = vector.load %arg5[%c0_4, %c0_5] : memref<64x1xf32, #tpu.memory_space<vmem>>, vector<64x1xf32>
    %9 = vector.broadcast %8 : vector<64x1xf32> to vector<64x128xf32>
    %10 = arith.mulf %7, %9 : vector<64x128xf32>
    %c0_6 = arith.constant 0 : index
    %c0_7 = arith.constant 0 : index
    %11 = vector.load %arg6[%c0_6, %c0_7] : memref<1x128xf32, #tpu.memory_space<vmem>>, vector<1x128xf32>
    %12 = vector.broadcast %11 : vector<1x128xf32> to vector<64x128xf32>
    %13 = arith.addf %10, %12 : vector<64x128xf32>
    %cst_8 = arith.constant 0.000000e+00 : f32
    %14 = vector.broadcast %cst_8 : f32 to vector<64x128xf32>
    %15 = arith.maximumf %13, %14 : vector<64x128xf32>
    %c0_9 = arith.constant 0 : index
    %c0_10 = arith.constant 0 : index
    %16 = vector.load %arg7[%c0_9, %c0_10] : memref<64x128xf32, #tpu.memory_space<vmem>>, vector<64x128xf32>
    tpu.vector_store %arg7[%c0_9, %c0_10], %15 {strides = array<i32>} : memref<64x128xf32, #tpu.memory_space<vmem>>, vector<64x128xf32>,
    return
  }
  func.func @transform_0(%arg0: i32, %arg1: i32) -> (i32, i32) {
    %c0_i32 = arith.constant 0 : i32
    %c0_i32_0 = arith.constant 0 : i32
    %c0_i32_1 = arith.constant 0 : i32
    return %c0_i32, %c0_i32_0 : i32, i32
  }
  func.func @transform_1(%arg0: i32, %arg1: i32) -> (i32, i32) {
    %c0_i32 = arith.constant 0 : i32
    %c0_i32_0 = arith.constant 0 : i32
    %c0_i32_1 = arith.constant 0 : i32
    return %c0_i32, %c0_i32_0 : i32, i32
  }
  func.func @transform_2(%arg0: i32, %arg1: i32) -> (i32, i32) {
    %c0_i32 = arith.constant 0 : i32
    return %arg0, %arg1 : i32, i32
  }
  func.func @transform_3(%arg0: i32, %arg1: i32) -> (i32, i32) {
    %c0_i32 = arith.constant 0 : i32
    %c0_i32_0 = arith.constant 0 : i32
    return %arg0, %c0_i32 : i32, i32
  }
  func.func @transform_4(%arg0: i32, %arg1: i32) -> (i32, i32) {
    %c0_i32 = arith.constant 0 : i32
    %c0_i32_0 = arith.constant 0 : i32
    %c0_i32_1 = arith.constant 0 : i32
    return %c0_i32, %c0_i32_0 : i32, i32
  }
  func.func @transform_5(%arg0: i32, %arg1: i32) -> (i32, i32) {
    %c0_i32 = arith.constant 0 : i32
    %c0_i32_0 = arith.constant 0 : i32
    return %arg0, %c0_i32 : i32, i32
  }
}

module attributes {stable_mosaic.version = 11 : i64} {
  func.func @gcn_layer_kernel(%arg0: i32, %arg1: i32, %arg2: memref<128x128xbf16, #tpu.memory_space<vmem>>, %arg3: memref<128x128xbf16, #tpu.memory_space<vmem>>, %arg4: memref<64x128xi8, #tpu.memory_space<vmem>>, %arg5: memref<64x1xf32, #tpu.memory_space<vmem>>, %arg6: memref<1x128xf32, #tpu.memory_space<vmem>>, %arg7: memref<64x128xf32, #tpu.memory_space<vmem>>, %arg8: memref<128x128xbf16, #tpu.memory_space<vmem>>) attributes {dimension_semantics = [#tpu.dimension_semantics<parallel>, #tpu.dimension_semantics<arbitrary>], iteration_bounds = array<i64: 2, 1>, scalar_prefetch = 0 : i64, scratch_operands = 1 : i64, tpu.core_type = #tpu.core_type<tc>, window_params = [{pipeline_mode = #tpu.pipeline_mode<synchronous>, transform_indices = @transform_0, window_bounds = array<i64: 128, 128>}, {pipeline_mode = #tpu.pipeline_mode<synchronous>, transform_indices = @transform_1, window_bounds = array<i64: 128, 128>}, {transform_indices = @transform_2, window_bounds = array<i64: 64, 128>}, {transform_indices = @transform_3, window_bounds = array<i64: 64, 1>}, {pipeline_mode = #tpu.pipeline_mode<synchronous>, transform_indices = @transform_4, window_bounds = array<i64: 1, 128>}, {transform_indices = @transform_5, window_bounds = array<i64: 64, 128>}]} {
    %c0_i32 = arith.constant 0 : i32
    %0 = arith.cmpi eq, %arg1, %c0_i32 : i32
    %1 = arith.extui %0 : i1 to i32
    %c0_i32_0 = arith.constant 0 : i32
    %2 = arith.cmpi ne, %1, %c0_i32_0 : i32
    scf.if %2 {
      %c0_10 = arith.constant 0 : index
      %c0_11 = arith.constant 0 : index
      %15 = vector.load %arg2[%c0_10, %c0_11] : memref<128x128xbf16, #tpu.memory_space<vmem>>, vector<128x128xbf16>
      %c0_12 = arith.constant 0 : index
      %c0_13 = arith.constant 0 : index
      %16 = vector.load %arg3[%c0_12, %c0_13] : memref<128x128xbf16, #tpu.memory_space<vmem>>, vector<128x128xbf16>
      %cst_14 = arith.constant dense<0.000000e+00> : vector<128x128xf32>
      %17 = tpu.matmul %15, %16, %cst_14 {dimension_numbers = #tpu.dot_dimension_numbers<[1], [0], [0], [1], [0, 0, 1, 1], [], []>} : vector<128x128xbf16>, vector<128x128xbf16>, vector<128x128xf32> -> vector<128x128xf32>
      %18 = arith.truncf %17 : vector<128x128xf32> to vector<128x128xbf16>
      %c0_15 = arith.constant 0 : index
      %c0_16 = arith.constant 0 : index
      %19 = vector.load %arg8[%c0_15, %c0_16] : memref<128x128xbf16, #tpu.memory_space<vmem>>, vector<128x128xbf16>
      tpu.vector_store %arg8[%c0_15, %c0_16], %18 {strides = array<i32>} : memref<128x128xbf16, #tpu.memory_space<vmem>>, vector<128x128xbf16>,
    } else {
    }
    %c0 = arith.constant 0 : index
    %c0_1 = arith.constant 0 : index
    %3 = vector.load %arg4[%c0, %c0_1] : memref<64x128xi8, #tpu.memory_space<vmem>>, vector<64x128xi8>
    %4 = arith.sitofp %3 : vector<64x128xi8> to vector<64x128xf32>
    %5 = arith.truncf %4 : vector<64x128xf32> to vector<64x128xbf16>
    %c0_2 = arith.constant 0 : index
    %c0_3 = arith.constant 0 : index
    %6 = vector.load %arg8[%c0_2, %c0_3] : memref<128x128xbf16, #tpu.memory_space<vmem>>, vector<128x128xbf16>
    %cst = arith.constant dense<0.000000e+00> : vector<64x128xf32>
    %7 = tpu.matmul %5, %6, %cst {dimension_numbers = #tpu.dot_dimension_numbers<[1], [0], [0], [1], [0, 0, 1, 1], [], []>} : vector<64x128xbf16>, vector<128x128xbf16>, vector<64x128xf32> -> vector<64x128xf32>
    %c0_4 = arith.constant 0 : index
    %c0_5 = arith.constant 0 : index
    %8 = vector.load %arg5[%c0_4, %c0_5] : memref<64x1xf32, #tpu.memory_space<vmem>>, vector<64x1xf32>
    %9 = vector.broadcast %8 : vector<64x1xf32> to vector<64x128xf32>
    %10 = arith.mulf %7, %9 : vector<64x128xf32>
    %c0_6 = arith.constant 0 : index
    %c0_7 = arith.constant 0 : index
    %11 = vector.load %arg6[%c0_6, %c0_7] : memref<1x128xf32, #tpu.memory_space<vmem>>, vector<1x128xf32>
    %12 = vector.broadcast %11 : vector<1x128xf32> to vector<64x128xf32>
    %13 = arith.addf %10, %12 : vector<64x128xf32>
    %c0_8 = arith.constant 0 : index
    %c0_9 = arith.constant 0 : index
    %14 = vector.load %arg7[%c0_8, %c0_9] : memref<64x128xf32, #tpu.memory_space<vmem>>, vector<64x128xf32>
    tpu.vector_store %arg7[%c0_8, %c0_9], %13 {strides = array<i32>} : memref<64x128xf32, #tpu.memory_space<vmem>>, vector<64x128xf32>,
    return
  }
  func.func @transform_0(%arg0: i32, %arg1: i32) -> (i32, i32) {
    %c0_i32 = arith.constant 0 : i32
    %c0_i32_0 = arith.constant 0 : i32
    %c0_i32_1 = arith.constant 0 : i32
    return %c0_i32, %c0_i32_0 : i32, i32
  }
  func.func @transform_1(%arg0: i32, %arg1: i32) -> (i32, i32) {
    %c0_i32 = arith.constant 0 : i32
    %c0_i32_0 = arith.constant 0 : i32
    %c0_i32_1 = arith.constant 0 : i32
    return %c0_i32, %c0_i32_0 : i32, i32
  }
  func.func @transform_2(%arg0: i32, %arg1: i32) -> (i32, i32) {
    %c0_i32 = arith.constant 0 : i32
    return %arg0, %arg1 : i32, i32
  }
  func.func @transform_3(%arg0: i32, %arg1: i32) -> (i32, i32) {
    %c0_i32 = arith.constant 0 : i32
    %c0_i32_0 = arith.constant 0 : i32
    return %arg0, %c0_i32 : i32, i32
  }
  func.func @transform_4(%arg0: i32, %arg1: i32) -> (i32, i32) {
    %c0_i32 = arith.constant 0 : i32
    %c0_i32_0 = arith.constant 0 : i32
    %c0_i32_1 = arith.constant 0 : i32
    return %c0_i32, %c0_i32_0 : i32, i32
  }
  func.func @transform_5(%arg0: i32, %arg1: i32) -> (i32, i32) {
    %c0_i32 = arith.constant 0 : i32
    %c0_i32_0 = arith.constant 0 : i32
    return %arg0, %c0_i32 : i32, i32
  }
}

</mosaic_0001>

<bundles_post_ra>
// kernel: gcn_forward.2
= control target key start
LH: loop header
LB: loop body
LE: loop exit
PB: predicated region body
PF: predicated region fallthrough
CT: control target
= control target key end

     0   :  { %s1015_s18 = smov 0   ;;  %s1017_s19 = smov 0   ;;  %s1133_s0 = inlined_call_operand.vmem [shape: bf16[128,128], index: 0, kind: input, shape index: {}]   ;;  %s1134_s1 = inlined_call_operand.vmem [shape: bf16[128,128], index: 1, kind: input, shape index: {}]   ;;  %s1135_s2 = inlined_call_operand.vmem [shape: s8[128,128], index: 2, kind: input, shape index: {}]   ;;  %s1136_s3 = inlined_call_operand.vmem [shape: f32[128,1], index: 3, kind: input, shape index: {}]   ;;  %s1137_s4 = inlined_call_operand.vmem [shape: f32[1,128], index: 4, kind: input, shape index: {}]   ;;  %s1138_s5 = inlined_call_operand.vmem [shape: f32[128,128], index: 5, kind: output, shape index: {}]  }
   0x1   :  { %s1019_s20 = smov 0  }
   0x2 LB: > { %s27_s21 = sadd.s32 1, %s978_s19  ;;  %p803_p0 = scmp.ge.s32.totalorder %s982_s20, 1  ;;  %s982_s20 = sphi %s1019_s20, %s15_s20   ;;  %s978_s19 = sphi %s1017_s19, %s1140_s19   ;;  %s974_s18 = sphi %s1015_s18, %s1139_s18  }
   0x3   : > { %p29_p1 = scmp.ge.s32.totalorder %s27_s21, 2  ;;  %p216_p2 = scmp.lt.s32.totalorder %s982_s20, 3 }
   0x5   : > { %s1142_s21 = smov (%p29_p1, %s27_s21), 0  ;;  %p217_p3 = pnand %p803_p0, %p216_p2 }
   0x6   : > { %v944_v0 = vld [vmem:[%s1134_s1] sm:$0xff] (!%p217_p3)   ;;  %v945_v1 = vld [vmem:[%s1134_s1 + $0x8] sm:$0xff] (!%p217_p3)   ;;  %v946_v2 = vld [vmem:[%s1134_s1 + $0x10] sm:$0xff] (!%p217_p3)   ;;  %s804_s8 = sshll.u32 (!%p217_p3), %s974_s18, 3  ;;  %v984_v21 = vmov (!%p217_p3), 0  }
   0x7   : > { %220 = sbr.rel (%p217_p3) target bundleno = 518 (0x206), region = 40  ;;  %861 = vmatprep.subr.bf16.mxu0 (!%p217_p3), %v944_v0  ;;  %v947_v3 = vld [vmem:[%s1134_s1 + $0x18] sm:$0xff] (!%p217_p3)   ;;  %v952_v4 = vld [vmem:[%s1133_s0] sm:$0xff] (!%p217_p3)   ;;  %v949_v6 = vld [vmem:[%s1134_s1 + $0x28] sm:$0xff] (!%p217_p3)   ;;  %p253_p4 = scmp.lt.s32.totalorder (!%p217_p3), %s804_s8, 15  ;;  %943 = vset.pattern.permute.xlu1 (!%p217_p3), %v984_v21 }
   0x8   : > { %862 = vmatpush3.bf16.msra.mxu0 (!%p217_p3), %v944_v0  ;;  %877 = vmatprep.mubr.bf16.mxu0 (!%p217_p3), %v952_v4  ;;  %v948_v5 = vld [vmem:[%s1134_s1 + $0x20] sm:$0xff] (!%p217_p3)   ;;  %v950_v7 = vld [vmem:[%s1134_s1 + $0x30] sm:$0xff] (!%p217_p3)   ;;  %v951_v8 = vld [vmem:[%s1134_s1 + $0x38] sm:$0xff] (!%p217_p3)  }
   0x9   : > { %863 = vmatprep.subr.bf16.mxu0 (!%p217_p3), %v945_v1  ;;  %v953_v9 = vld [vmem:[%s1133_s0 + $0x8] sm:$0xff] (!%p217_p3)   ;;  %v954_v10 = vld [vmem:[%s1133_s0 + $0x10] sm:$0xff] (!%p217_p3)   ;;  %v955_v11 = vld [vmem:[%s1133_s0 + $0x18] sm:$0xff] (!%p217_p3)   ;;  %942 = vset.pattern.permute.xlu0 (!%p217_p3), %v984_v21 }
   0xa   : > { %v956_v12 = vld [vmem:[%s1133_s0 + $0x20] sm:$0xff] (!%p217_p3)   ;;  %v957_v13 = vld [vmem:[%s1133_s0 + $0x28] sm:$0xff] (!%p217_p3)   ;;  %v958_v14 = vld [vmem:[%s1133_s0 + $0x30] sm:$0xff] (!%p217_p3)  }
   0xb   : > { %v959_v15 = vld [vmem:[%s1133_s0 + $0x38] sm:$0xff] (!%p217_p3)  }
   0xc   : > { %864 = vmatpush3.bf16.msra.mxu0 (!%p217_p3), %v945_v1 }
   0xd   : > { %865 = vmatprep.subr.bf16.mxu0 (!%p217_p3), %v946_v2 }
   0xe   : > { %s1144_s8 = smov (!%p253_p4, %s804_s8), 15 }
   0xf   : > { %s805_s9 = sshll.u32 %s1144_s8, 1  ;;  %s807_s18 = sshll.u32 %s1144_s8, 3 }
  0x10   : > { %866 = vmatpush3.bf16.msra.mxu0 %v946_v2  ;;  %s1090_s12 = scalar_lea.vmem %s1135_s2, %s805_s9  ;;  %s265_s15 = scalar_lea.vmem %s1136_s3, %s807_s18 }
  0x11   : > { %867 = vmatprep.subr.bf16.mxu0 %v947_v3  ;;  %v519_v16 = vld [vmem:[%s1090_s12] sm:$0x3]  ;;  %v520_v17 = vld [vmem:[%s1090_s12 + $0x2] sm:$0x3]  ;;  %v634_v22 = vld [vmem:[%s265_s15 + $0x10] sm:$0xff]  ;;  %s1114_s24 = scalar_lea.vmem %s1138_s5, %s807_s18 }
  0x12   : > { %v527_v18 = vunpack.c.l.s8.bf16 %v519_v16  ;;  %v528_v19 = vunpack.c.l.s8.bf16 %v520_v17  ;;  %v632_v23 = vld [vmem:[%s265_s15] sm:$0xff]  ;;  %652 = vperm.xlu1 %943, %v634_v22   ;;  %v635_v24 = vld [vmem:[%s265_s15 + $0x18] sm:$0xff]  ;;  %v633_v25 = vld [vmem:[%s265_s15 + $0x8] sm:$0xff] }
  0x13   : > { %642 = vperm.xlu0 %942, %v632_v23   ;;  %v637_v26 = vld [vmem:[%s265_s15 + $0x28] sm:$0xff]  ;;  %v636_v27 = vld [vmem:[%s265_s15 + $0x20] sm:$0xff]  ;;  %v639_v28 = vld [vmem:[%s265_s15 + $0x38] sm:$0xff] }
  0x14   : > { %868 = vmatpush3.bf16.msra.mxu0 %v947_v3  ;;  %v826_v20 = vcombine.low %v527_v18, %v528_v19  ;;  %v638_v29 = vld [vmem:[%s265_s15 + $0x30] sm:$0xff]  ;;  %v521_v53 = vld [vmem:[%s1090_s12 + $0x4] sm:$0x3]  ;;  %v522_v54 = vld [vmem:[%s1090_s12 + $0x6] sm:$0x3] }
  0x15   : > { %869 = vmatprep.subr.bf16.mxu0 %v948_v5  ;;  %v523_v56 = vld [vmem:[%s1090_s12 + $0x8] sm:$0x3]  ;;  %v524_v57 = vld [vmem:[%s1090_s12 + $0xa] sm:$0x3]  ;;  %v529_v58 = vunpack.c.l.s8.bf16 %v521_v53  ;;  %v530_v59 = vunpack.c.l.s8.bf16 %v522_v54  ;;  %v525_v0 = vld [vmem:[%s1090_s12 + $0xc] sm:$0x3] }
  0x16   : > { %909 = vmatprep.mubr.bf16.mxu1 %v826_v20  ;;  %657 = vperm.xlu1 %943, %v635_v24   ;;  %v531_v60 = vunpack.c.l.s8.bf16 %v523_v56  ;;  %v532_v61 = vunpack.c.l.s8.bf16 %v524_v57  ;;  %v526_v1 = vld [vmem:[%s1090_s12 + $0xe] sm:$0x3]  ;;  %v533_v2 = vunpack.c.l.s8.bf16 %v525_v0 }
  0x17   : > { %647 = vperm.xlu0 %942, %v633_v25   ;;  %v827_v62 = vcombine.low %v529_v58, %v530_v59  ;;  %v534_v3 = vunpack.c.l.s8.bf16 %v526_v1 }
  0x18   : > { %870 = vmatpush3.bf16.msra.mxu0 %v948_v5  ;;  %v828_v63 = vcombine.low %v531_v60, %v532_v61 }
  0x19   : > { %871 = vmatprep.subr.bf16.mxu0 %v949_v6  ;;  %v829_v4 = vcombine.low %v533_v2, %v534_v3 }
  0x1a   : > { %667 = vperm.xlu1 %943, %v637_v26  }
  0x1b   : > { %662 = vperm.xlu0 %942, %v636_v27  }
  0x1c   : > { %872 = vmatpush3.bf16.msra.mxu0 %v949_v6 }
  0x1d   : > { %873 = vmatprep.subr.bf16.mxu0 %v950_v7 }
  0x1e   : > { %677 = vperm.xlu1 %943, %v639_v28  }
  0x1f   : > { %672 = vperm.xlu0 %942, %v638_v29  }
  0x20   : > { %874 = vmatpush3.bf16.msra.mxu0 %v950_v7 }
  0x21   : > { %875 = vmatprep.subr.bf16.mxu0 %v951_v8 }
  0x24   : > { %876 = vmatpush3.bf16.msra.mxu0 %v951_v8 }
  0x27   : > { %878 = vmatmul.mubr.bf16.vlgmr.msra.gmra.mrb[0].mxu0 %v953_v9 }
  0x28   : > { %881 = vmatprep.mubr.bf16.mxu0 %v954_v10  ;;  %v830_v10 = vld [vmem:[%s1137_s4] ss:$0 sm:$0xff] }
  0x2f   : > { %882 = vmatmul.mubr.bf16.gmra.mrb[4].mxu0 %v955_v11 }
  0x30   : > { %885 = vmatprep.mubr.bf16.mxu0 %v956_v12 }
  0x37   : > { %886 = vmatmul.mubr.bf16.gmra.mrb[8].mxu0 %v957_v13 }
  0x38   : > { %889 = vmatprep.mubr.bf16.mxu0 %v958_v14 }
  0x3f   : > { %890 = vmatmul.mubr.bf16.gmra.mrb[12].mxu0 %v959_v15 }
  0x91   : > { %v653_v6 = vpop.permute.xlu1 %652 }
  0x92   : > { %v643_v5 = vpop.permute.xlu0 %642 }
  0x95   : > { %v658_v8 = vpop.permute.xlu1 %657 }
  0x96   : > { %v648_v7 = vpop.permute.xlu0 %647 }
  0x99   : > { %v668_v19 = vpop.permute.xlu1 %667 }
  0x9a   : > { %v663_v13 = vpop.permute.xlu0 %662 }
  0x9e   : > { %v673_v27 = vpop.permute.xlu0 %672 }
  0xfa   : > { %v879_v30 = vpop.f32.mrb[0].mxu0 }
  0xfb   : > { %v440_v31 = vpop.f32.mrb[1].mxu0 }
  0xfc   : > { %v880_v32 = vpop.f32.mrb[2].mxu0 }
  0xfd   : > { %v504_v33 = vpack.c.bf16 %v880_v32, %v879_v30  ;;  %v443_v34 = vpop.f32.mrb[3].mxu0  ;;  %v678_v32 = vpop.permute.xlu1 %677 }
  0xfe   : > { %v503_v35 = vpack.c.bf16 %v443_v34, %v440_v31 }
 0x100   : > { %893 = vmatprep.subr.bf16.mxu1 %v503_v35 }
 0x101   : > { %894 = vmatpush3.bf16.msra.mxu1 %v503_v35 }
 0x102   : > { %v883_v36 = vpop.f32.mrb[4].mxu0  ;;  %895 = vmatprep.subr.bf16.mxu1 %v504_v33 }
 0x103   : > { %v456_v37 = vpop.f32.mrb[5].mxu0 }
 0x104   : > { %v884_v38 = vpop.f32.mrb[6].mxu0 }
 0x105   : > { %v506_v39 = vpack.c.bf16 %v884_v38, %v883_v36  ;;  %v459_v40 = vpop.f32.mrb[7].mxu0  ;;  %896 = vmatpush3.bf16.msra.mxu1 %v504_v33 }
 0x106   : > { %v505_v41 = vpack.c.bf16 %v459_v40, %v456_v37 }
 0x108   : > { %897 = vmatprep.subr.bf16.mxu1 %v505_v41 }
 0x109   : > { %898 = vmatpush3.bf16.msra.mxu1 %v505_v41 }
 0x10a   : > { %v887_v42 = vpop.f32.mrb[8].mxu0  ;;  %899 = vmatprep.subr.bf16.mxu1 %v506_v39 }
 0x10b   : > { %v472_v43 = vpop.f32.mrb[9].mxu0 }
 0x10c   : > { %v888_v44 = vpop.f32.mrb[10].mxu0 }
 0x10d   : > { %v508_v45 = vpack.c.bf16 %v888_v44, %v887_v42  ;;  %v475_v46 = vpop.f32.mrb[11].mxu0  ;;  %900 = vmatpush3.bf16.msra.mxu1 %v506_v39 }
 0x10e   : > { %v507_v47 = vpack.c.bf16 %v475_v46, %v472_v43 }
 0x110   : > { %901 = vmatprep.subr.bf16.mxu1 %v507_v47 }
 0x111   : > { %902 = vmatpush3.bf16.msra.mxu1 %v507_v47 }
 0x112   : > { %v891_v48 = vpop.f32.mrb[12].mxu0  ;;  %903 = vmatprep.subr.bf16.mxu1 %v508_v45 }
 0x113   : > { %v488_v49 = vpop.f32.mrb[13].mxu0 }
 0x114   : > { %v892_v50 = vpop.f32.mrb[14].mxu0 }
 0x115   : > { %v510_v51 = vpack.c.bf16 %v892_v50, %v891_v48  ;;  %v491_v52 = vpop.f32.mrb[15].mxu0  ;;  %904 = vmatpush3.bf16.msra.mxu1 %v508_v45 }
 0x116   : > { %v509_v55 = vpack.c.bf16 %v491_v52, %v488_v49 }
 0x118   : > { %905 = vmatprep.subr.bf16.mxu1 %v509_v55 }
 0x119   : > { %906 = vmatpush3.bf16.msra.mxu1 %v509_v55 }
 0x11a   : > { %907 = vmatprep.subr.bf16.mxu1 %v510_v51 }
 0x11d   : > { %908 = vmatpush3.bf16.msra.mxu1 %v510_v51 }
 0x120   : > { %910 = vmatmul.mubr.bf16.vlgmr.msra.gmra.mrb[0].mxu1 %v827_v62 }
 0x121   : > { %913 = vmatprep.mubr.bf16.mxu1 %v828_v63 }
 0x128   : > { %914 = vmatmul.mubr.bf16.gmra.mrb[4].mxu1 %v829_v4 }
 0x1f3   : > { %v911_v9 = vpop.f32.mrb[0].mxu1 }
 0x1f4   : > { %v682_v11 = vmul.f32 %v911_v9, %v653_v6  ;;  %v601_v12 = vpop.f32.mrb[1].mxu1 }
 0x1f5   : > { %v680_v14 = vmul.f32 %v643_v5, %v601_v12  ;;  %v912_v15 = vpop.f32.mrb[2].mxu1 }
 0x1f6   : > { %v697_v16 = vadd.f32 %v830_v10, %v682_v11  ;;  %v683_v17 = vmul.f32 %v912_v15, %v658_v8  ;;  %v604_v18 = vpop.f32.mrb[3].mxu1 }
 0x1f7   : > { %v695_v20 = vadd.f32 %v830_v10, %v680_v14  ;;  %v681_v21 = vmul.f32 %v648_v7, %v604_v18 }
 0x1f8   : > { %v705_v22 = vmax.f32 %v697_v16, 0.0  ;;  %v698_v23 = vadd.f32 %v830_v10, %v683_v17 }
 0x1f9   : > { %v703_v24 = vmax.f32 %v695_v20, 0.0  ;;  %v696_v25 = vadd.f32 %v830_v10, %v681_v21 }
 0x1fa   : > { %713 = vst [vmem:[%s1114_s24 + $0x10] sm:$0xff] %v705_v22  ;;  %v706_v26 = vmax.f32 %v698_v23, 0.0 }
 0x1fb   : > { %711 = vst [vmem:[%s1114_s24] sm:$0xff] %v703_v24  ;;  %v704_v28 = vmax.f32 %v696_v25, 0.0  ;;  %v915_v29 = vpop.f32.mrb[4].mxu1 }
 0x1fc   : > { %714 = vst [vmem:[%s1114_s24 + $0x18] sm:$0xff] %v706_v26  ;;  %v686_v30 = vmul.f32 %v915_v29, %v673_v27  ;;  %v617_v31 = vpop.f32.mrb[5].mxu1 }
 0x1fd   : > { %712 = vst [vmem:[%s1114_s24 + $0x8] sm:$0xff] %v704_v28  ;;  %v684_v33 = vmul.f32 %v663_v13, %v617_v31  ;;  %v916_v34 = vpop.f32.mrb[6].mxu1 }
 0x1fe   : > { %v701_v35 = vadd.f32 %v830_v10, %v686_v30  ;;  %v687_v36 = vmul.f32 %v916_v34, %v678_v32  ;;  %v620_v37 = vpop.f32.mrb[7].mxu1 }
 0x1ff   : > { %v699_v38 = vadd.f32 %v830_v10, %v684_v33  ;;  %v685_v39 = vmul.f32 %v668_v19, %v620_v37 }
 0x200   : > { %v709_v40 = vmax.f32 %v701_v35, 0.0  ;;  %v702_v41 = vadd.f32 %v830_v10, %v687_v36 }
 0x201   : > { %v707_v42 = vmax.f32 %v699_v38, 0.0  ;;  %v700_v43 = vadd.f32 %v830_v10, %v685_v39 }
 0x202   : > { %717 = vst [vmem:[%s1114_s24 + $0x30] sm:$0xff] %v709_v40  ;;  %v710_v44 = vmax.f32 %v702_v41, 0.0 }
 0x203   : > { %715 = vst [vmem:[%s1114_s24 + $0x20] sm:$0xff] %v707_v42  ;;  %v708_v45 = vmax.f32 %v700_v43, 0.0 }
 0x204   : > { %718 = vst [vmem:[%s1114_s24 + $0x38] sm:$0xff] %v710_v44 }
 0x205   : > { %716 = vst [vmem:[%s1114_s24 + $0x28] sm:$0xff] %v708_v45 }
 0x206 PF: > { %s15_s20 = sadd.s32 1, %s982_s20   ;;  %s1139_s18 = smov %s978_s19 }
 0x207   : > { %p12_p5 = scmp.ge.s32.totalorder %s15_s20, 4   ;;  %s1140_s19 = smov %s1142_s21 }
 0x209   :  { %14 = sbr.rel (!%p12_p5) target bundleno = 2 (0x2), region = 77 }

// kernel: gcn_forward.3
= control target key start
LH: loop header
LB: loop body
LE: loop exit
PB: predicated region body
PF: predicated region fallthrough
CT: control target
= control target key end

     0   :  { %s1007_s18 = smov 0   ;;  %s1009_s19 = smov 0   ;;  %s1125_s0 = inlined_call_operand.vmem [shape: bf16[128,128], index: 0, kind: input, shape index: {}]   ;;  %s1126_s1 = inlined_call_operand.vmem [shape: bf16[128,128], index: 1, kind: input, shape index: {}]   ;;  %s1127_s2 = inlined_call_operand.vmem [shape: s8[128,128], index: 2, kind: input, shape index: {}]   ;;  %s1128_s3 = inlined_call_operand.vmem [shape: f32[128,1], index: 3, kind: input, shape index: {}]   ;;  %s1129_s4 = inlined_call_operand.vmem [shape: f32[1,128], index: 4, kind: input, shape index: {}]   ;;  %s1130_s5 = inlined_call_operand.vmem [shape: f32[128,128], index: 5, kind: output, shape index: {}]  }
   0x1   :  { %s1011_s20 = smov 0  }
   0x2 LB: > { %s27_s21 = sadd.s32 1, %s970_s19  ;;  %p795_p0 = scmp.ge.s32.totalorder %s974_s20, 1  ;;  %s974_s20 = sphi %s1011_s20, %s15_s20   ;;  %s970_s19 = sphi %s1009_s19, %s1132_s19   ;;  %s966_s18 = sphi %s1007_s18, %s1131_s18  }
   0x3   : > { %p29_p1 = scmp.ge.s32.totalorder %s27_s21, 2  ;;  %p216_p2 = scmp.lt.s32.totalorder %s974_s20, 3 }
   0x5   : > { %s1134_s21 = smov (%p29_p1, %s27_s21), 0  ;;  %p217_p3 = pnand %p795_p0, %p216_p2 }
   0x6   : > { %v936_v0 = vld [vmem:[%s1126_s1] sm:$0xff] (!%p217_p3)   ;;  %v937_v1 = vld [vmem:[%s1126_s1 + $0x8] sm:$0xff] (!%p217_p3)   ;;  %v938_v2 = vld [vmem:[%s1126_s1 + $0x10] sm:$0xff] (!%p217_p3)   ;;  %s796_s8 = sshll.u32 (!%p217_p3), %s966_s18, 3  ;;  %v976_v21 = vmov (!%p217_p3), 0  }
   0x7   : > { %220 = sbr.rel (%p217_p3) target bundleno = 516 (0x204), region = 40  ;;  %853 = vmatprep.subr.bf16.mxu0 (!%p217_p3), %v936_v0  ;;  %v939_v3 = vld [vmem:[%s1126_s1 + $0x18] sm:$0xff] (!%p217_p3)   ;;  %v944_v4 = vld [vmem:[%s1125_s0] sm:$0xff] (!%p217_p3)   ;;  %v941_v6 = vld [vmem:[%s1126_s1 + $0x28] sm:$0xff] (!%p217_p3)   ;;  %p253_p4 = scmp.lt.s32.totalorder (!%p217_p3), %s796_s8, 15  ;;  %935 = vset.pattern.permute.xlu1 (!%p217_p3), %v976_v21 }
   0x8   : > { %854 = vmatpush3.bf16.msra.mxu0 (!%p217_p3), %v936_v0  ;;  %869 = vmatprep.mubr.bf16.mxu0 (!%p217_p3), %v944_v4  ;;  %v940_v5 = vld [vmem:[%s1126_s1 + $0x20] sm:$0xff] (!%p217_p3)   ;;  %v942_v7 = vld [vmem:[%s1126_s1 + $0x30] sm:$0xff] (!%p217_p3)   ;;  %v943_v8 = vld [vmem:[%s1126_s1 + $0x38] sm:$0xff] (!%p217_p3)  }
   0x9   : > { %855 = vmatprep.subr.bf16.mxu0 (!%p217_p3), %v937_v1  ;;  %v945_v9 = vld [vmem:[%s1125_s0 + $0x8] sm:$0xff] (!%p217_p3)   ;;  %v946_v10 = vld [vmem:[%s1125_s0 + $0x10] sm:$0xff] (!%p217_p3)   ;;  %v947_v11 = vld [vmem:[%s1125_s0 + $0x18] sm:$0xff] (!%p217_p3)   ;;  %934 = vset.pattern.permute.xlu0 (!%p217_p3), %v976_v21 }
   0xa   : > { %v948_v12 = vld [vmem:[%s1125_s0 + $0x20] sm:$0xff] (!%p217_p3)   ;;  %v949_v13 = vld [vmem:[%s1125_s0 + $0x28] sm:$0xff] (!%p217_p3)   ;;  %v950_v14 = vld [vmem:[%s1125_s0 + $0x30] sm:$0xff] (!%p217_p3)  }
   0xb   : > { %v951_v15 = vld [vmem:[%s1125_s0 + $0x38] sm:$0xff] (!%p217_p3)  }
   0xc   : > { %856 = vmatpush3.bf16.msra.mxu0 (!%p217_p3), %v937_v1 }
   0xd   : > { %857 = vmatprep.subr.bf16.mxu0 (!%p217_p3), %v938_v2 }
   0xe   : > { %s1136_s8 = smov (!%p253_p4, %s796_s8), 15 }
   0xf   : > { %s797_s9 = sshll.u32 %s1136_s8, 1  ;;  %s799_s18 = sshll.u32 %s1136_s8, 3 }
  0x10   : > { %858 = vmatpush3.bf16.msra.mxu0 %v938_v2  ;;  %s1082_s12 = scalar_lea.vmem %s1127_s2, %s797_s9  ;;  %s265_s15 = scalar_lea.vmem %s1128_s3, %s799_s18 }
  0x11   : > { %859 = vmatprep.subr.bf16.mxu0 %v939_v3  ;;  %v519_v16 = vld [vmem:[%s1082_s12] sm:$0x3]  ;;  %v520_v17 = vld [vmem:[%s1082_s12 + $0x2] sm:$0x3]  ;;  %v634_v22 = vld [vmem:[%s265_s15 + $0x10] sm:$0xff]  ;;  %s1106_s24 = scalar_lea.vmem %s1130_s5, %s799_s18 }
  0x12   : > { %v527_v18 = vunpack.c.l.s8.bf16 %v519_v16  ;;  %v528_v19 = vunpack.c.l.s8.bf16 %v520_v17  ;;  %v632_v23 = vld [vmem:[%s265_s15] sm:$0xff]  ;;  %652 = vperm.xlu1 %935, %v634_v22   ;;  %v635_v24 = vld [vmem:[%s265_s15 + $0x18] sm:$0xff]  ;;  %v633_v25 = vld [vmem:[%s265_s15 + $0x8] sm:$0xff] }
  0x13   : > { %642 = vperm.xlu0 %934, %v632_v23   ;;  %v637_v26 = vld [vmem:[%s265_s15 + $0x28] sm:$0xff]  ;;  %v636_v27 = vld [vmem:[%s265_s15 + $0x20] sm:$0xff]  ;;  %v639_v28 = vld [vmem:[%s265_s15 + $0x38] sm:$0xff] }
  0x14   : > { %860 = vmatpush3.bf16.msra.mxu0 %v939_v3  ;;  %v818_v20 = vcombine.low %v527_v18, %v528_v19  ;;  %v638_v29 = vld [vmem:[%s265_s15 + $0x30] sm:$0xff]  ;;  %v521_v53 = vld [vmem:[%s1082_s12 + $0x4] sm:$0x3]  ;;  %v522_v54 = vld [vmem:[%s1082_s12 + $0x6] sm:$0x3] }
  0x15   : > { %861 = vmatprep.subr.bf16.mxu0 %v940_v5  ;;  %v523_v56 = vld [vmem:[%s1082_s12 + $0x8] sm:$0x3]  ;;  %v524_v57 = vld [vmem:[%s1082_s12 + $0xa] sm:$0x3]  ;;  %v529_v58 = vunpack.c.l.s8.bf16 %v521_v53  ;;  %v530_v59 = vunpack.c.l.s8.bf16 %v522_v54  ;;  %v525_v0 = vld [vmem:[%s1082_s12 + $0xc] sm:$0x3] }
  0x16   : > { %901 = vmatprep.mubr.bf16.mxu1 %v818_v20  ;;  %657 = vperm.xlu1 %935, %v635_v24   ;;  %v531_v60 = vunpack.c.l.s8.bf16 %v523_v56  ;;  %v532_v61 = vunpack.c.l.s8.bf16 %v524_v57  ;;  %v526_v1 = vld [vmem:[%s1082_s12 + $0xe] sm:$0x3]  ;;  %v533_v2 = vunpack.c.l.s8.bf16 %v525_v0 }
  0x17   : > { %647 = vperm.xlu0 %934, %v633_v25   ;;  %v819_v62 = vcombine.low %v529_v58, %v530_v59  ;;  %v534_v3 = vunpack.c.l.s8.bf16 %v526_v1 }
  0x18   : > { %862 = vmatpush3.bf16.msra.mxu0 %v940_v5  ;;  %v820_v63 = vcombine.low %v531_v60, %v532_v61 }
  0x19   : > { %863 = vmatprep.subr.bf16.mxu0 %v941_v6  ;;  %v821_v4 = vcombine.low %v533_v2, %v534_v3 }
  0x1a   : > { %667 = vperm.xlu1 %935, %v637_v26  }
  0x1b   : > { %662 = vperm.xlu0 %934, %v636_v27  }
  0x1c   : > { %864 = vmatpush3.bf16.msra.mxu0 %v941_v6 }
  0x1d   : > { %865 = vmatprep.subr.bf16.mxu0 %v942_v7 }
  0x1e   : > { %677 = vperm.xlu1 %935, %v639_v28  }
  0x1f   : > { %672 = vperm.xlu0 %934, %v638_v29  }
  0x20   : > { %866 = vmatpush3.bf16.msra.mxu0 %v942_v7 }
  0x21   : > { %867 = vmatprep.subr.bf16.mxu0 %v943_v8 }
  0x24   : > { %868 = vmatpush3.bf16.msra.mxu0 %v943_v8 }
  0x27   : > { %870 = vmatmul.mubr.bf16.vlgmr.msra.gmra.mrb[0].mxu0 %v945_v9 }
  0x28   : > { %873 = vmatprep.mubr.bf16.mxu0 %v946_v10  ;;  %v822_v10 = vld [vmem:[%s1129_s4] ss:$0 sm:$0xff] }
  0x2f   : > { %874 = vmatmul.mubr.bf16.gmra.mrb[4].mxu0 %v947_v11 }
  0x30   : > { %877 = vmatprep.mubr.bf16.mxu0 %v948_v12 }
  0x37   : > { %878 = vmatmul.mubr.bf16.gmra.mrb[8].mxu0 %v949_v13 }
  0x38   : > { %881 = vmatprep.mubr.bf16.mxu0 %v950_v14 }
  0x3f   : > { %882 = vmatmul.mubr.bf16.gmra.mrb[12].mxu0 %v951_v15 }
  0x91   : > { %v653_v6 = vpop.permute.xlu1 %652 }
  0x92   : > { %v643_v5 = vpop.permute.xlu0 %642 }
  0x95   : > { %v658_v8 = vpop.permute.xlu1 %657 }
  0x96   : > { %v648_v7 = vpop.permute.xlu0 %647 }
  0x99   : > { %v668_v19 = vpop.permute.xlu1 %667 }
  0x9a   : > { %v663_v13 = vpop.permute.xlu0 %662 }
  0x9d   : > { %v678_v28 = vpop.permute.xlu1 %677 }
  0x9e   : > { %v673_v24 = vpop.permute.xlu0 %672 }
  0xfa   : > { %v871_v30 = vpop.f32.mrb[0].mxu0 }
  0xfb   : > { %v440_v31 = vpop.f32.mrb[1].mxu0 }
  0xfc   : > { %v872_v32 = vpop.f32.mrb[2].mxu0 }
  0xfd   : > { %v504_v33 = vpack.c.bf16 %v872_v32, %v871_v30  ;;  %v443_v34 = vpop.f32.mrb[3].mxu0 }
  0xfe   : > { %v503_v35 = vpack.c.bf16 %v443_v34, %v440_v31 }
 0x100   : > { %885 = vmatprep.subr.bf16.mxu1 %v503_v35 }
 0x101   : > { %886 = vmatpush3.bf16.msra.mxu1 %v503_v35 }
 0x102   : > { %v875_v36 = vpop.f32.mrb[4].mxu0  ;;  %887 = vmatprep.subr.bf16.mxu1 %v504_v33 }
 0x103   : > { %v456_v37 = vpop.f32.mrb[5].mxu0 }
 0x104   : > { %v876_v38 = vpop.f32.mrb[6].mxu0 }
 0x105   : > { %v506_v39 = vpack.c.bf16 %v876_v38, %v875_v36  ;;  %v459_v40 = vpop.f32.mrb[7].mxu0  ;;  %888 = vmatpush3.bf16.msra.mxu1 %v504_v33 }
 0x106   : > { %v505_v41 = vpack.c.bf16 %v459_v40, %v456_v37 }
 0x108   : > { %889 = vmatprep.subr.bf16.mxu1 %v505_v41 }
 0x109   : > { %890 = vmatpush3.bf16.msra.mxu1 %v505_v41 }
 0x10a   : > { %v879_v42 = vpop.f32.mrb[8].mxu0  ;;  %891 = vmatprep.subr.bf16.mxu1 %v506_v39 }
 0x10b   : > { %v472_v43 = vpop.f32.mrb[9].mxu0 }
 0x10c   : > { %v880_v44 = vpop.f32.mrb[10].mxu0 }
 0x10d   : > { %v508_v45 = vpack.c.bf16 %v880_v44, %v879_v42  ;;  %v475_v46 = vpop.f32.mrb[11].mxu0  ;;  %892 = vmatpush3.bf16.msra.mxu1 %v506_v39 }
 0x10e   : > { %v507_v47 = vpack.c.bf16 %v475_v46, %v472_v43 }
 0x110   : > { %893 = vmatprep.subr.bf16.mxu1 %v507_v47 }
 0x111   : > { %894 = vmatpush3.bf16.msra.mxu1 %v507_v47 }
 0x112   : > { %v883_v48 = vpop.f32.mrb[12].mxu0  ;;  %895 = vmatprep.subr.bf16.mxu1 %v508_v45 }
 0x113   : > { %v488_v49 = vpop.f32.mrb[13].mxu0 }
 0x114   : > { %v884_v50 = vpop.f32.mrb[14].mxu0 }
 0x115   : > { %v510_v51 = vpack.c.bf16 %v884_v50, %v883_v48  ;;  %v491_v52 = vpop.f32.mrb[15].mxu0  ;;  %896 = vmatpush3.bf16.msra.mxu1 %v508_v45 }
 0x116   : > { %v509_v55 = vpack.c.bf16 %v491_v52, %v488_v49 }
 0x118   : > { %897 = vmatprep.subr.bf16.mxu1 %v509_v55 }
 0x119   : > { %898 = vmatpush3.bf16.msra.mxu1 %v509_v55 }
 0x11a   : > { %899 = vmatprep.subr.bf16.mxu1 %v510_v51 }
 0x11d   : > { %900 = vmatpush3.bf16.msra.mxu1 %v510_v51 }
 0x120   : > { %902 = vmatmul.mubr.bf16.vlgmr.msra.gmra.mrb[0].mxu1 %v819_v62 }
 0x121   : > { %905 = vmatprep.mubr.bf16.mxu1 %v820_v63 }
 0x128   : > { %906 = vmatmul.mubr.bf16.gmra.mrb[4].mxu1 %v821_v4 }
 0x1f3   : > { %v903_v9 = vpop.f32.mrb[0].mxu1 }
 0x1f4   : > { %v682_v11 = vmul.f32 %v903_v9, %v653_v6  ;;  %v601_v12 = vpop.f32.mrb[1].mxu1 }
 0x1f5   : > { %v680_v14 = vmul.f32 %v643_v5, %v601_v12  ;;  %v904_v15 = vpop.f32.mrb[2].mxu1 }
 0x1f6   : > { %v697_v16 = vadd.f32 %v822_v10, %v682_v11  ;;  %v683_v17 = vmul.f32 %v904_v15, %v658_v8  ;;  %v604_v18 = vpop.f32.mrb[3].mxu1 }
 0x1f7   : > { %v695_v20 = vadd.f32 %v822_v10, %v680_v14  ;;  %v681_v21 = vmul.f32 %v648_v7, %v604_v18 }
 0x1f8   : > { %705 = vst [vmem:[%s1106_s24 + $0x10] sm:$0xff] %v697_v16  ;;  %v698_v22 = vadd.f32 %v822_v10, %v683_v17 }
 0x1f9   : > { %703 = vst [vmem:[%s1106_s24] sm:$0xff] %v695_v20  ;;  %v696_v23 = vadd.f32 %v822_v10, %v681_v21 }
 0x1fa   : > { %706 = vst [vmem:[%s1106_s24 + $0x18] sm:$0xff] %v698_v22 }
 0x1fb   : > { %704 = vst [vmem:[%s1106_s24 + $0x8] sm:$0xff] %v696_v23  ;;  %v907_v25 = vpop.f32.mrb[4].mxu1 }
 0x1fc   : > { %v686_v26 = vmul.f32 %v907_v25, %v673_v24  ;;  %v617_v27 = vpop.f32.mrb[5].mxu1 }
 0x1fd   : > { %v684_v29 = vmul.f32 %v663_v13, %v617_v27  ;;  %v908_v30 = vpop.f32.mrb[6].mxu1 }
 0x1fe   : > { %v701_v31 = vadd.f32 %v822_v10, %v686_v26  ;;  %v687_v32 = vmul.f32 %v908_v30, %v678_v28  ;;  %v620_v33 = vpop.f32.mrb[7].mxu1 }
 0x1ff   : > { %v699_v34 = vadd.f32 %v822_v10, %v684_v29  ;;  %v685_v35 = vmul.f32 %v668_v19, %v620_v33 }
 0x200   : > { %709 = vst [vmem:[%s1106_s24 + $0x30] sm:$0xff] %v701_v31  ;;  %v702_v36 = vadd.f32 %v822_v10, %v687_v32 }
 0x201   : > { %707 = vst [vmem:[%s1106_s24 + $0x20] sm:$0xff] %v699_v34  ;;  %v700_v37 = vadd.f32 %v822_v10, %v685_v35 }
 0x202   : > { %710 = vst [vmem:[%s1106_s24 + $0x38] sm:$0xff] %v702_v36 }
 0x203   : > { %708 = vst [vmem:[%s1106_s24 + $0x28] sm:$0xff] %v700_v37 }
 0x204 PF: > { %s15_s20 = sadd.s32 1, %s974_s20   ;;  %s1131_s18 = smov %s970_s19 }
 0x205   : > { %p12_p5 = scmp.ge.s32.totalorder %s15_s20, 4   ;;  %s1132_s19 = smov %s1134_s21 }
 0x207   :  { %14 = sbr.rel (!%p12_p5) target bundleno = 2 (0x2), region = 77 }

</bundles_post_ra>
